<compile_context>
chip_gen: v6e
topology: v6e:2x2x1
jax: 0.10.0
libtpu: 0.0.40
codegen_flags: <defaults>
</compile_context>

<pallas_src>
import functools
import math

import jax
import jax.numpy as jnp
from jax.experimental import pallas as pl
from jax.experimental.pallas import tpu as pltpu

LN_EPS = 1e-5   # PyTorch nn.LayerNorm default
_LANE = 128
_SUBLANE = 8


def _round_up(x, m):
    return ((x + m - 1) // m) * m


def _state_encoder_kernel(x_ref, w1_ref, w2_ref, w3_ref, vec_ref, o_ref, *, out_features):
    """x_ref: (tm, Cin_pad); w*_ref: (Cin_pad|Cpad, Cpad); vec_ref: (16, Cpad) rows =
    [b1, g1, be1, b2, g2, be2, b3, g3, be3, <pad>]; o_ref: (tm, Cpad)."""
    cpad = o_ref.shape[-1]
    inv_n = 1.0 / out_features

    x = x_ref[...].astype(jnp.float32)
    vecs = vec_ref[...].astype(jnp.float32)

    lane_mask = None
    if out_features != cpad:
        # Only the first `out_features` lanes carry real data (hoisted, reused by all 3 LNs).
        lane_mask = jax.lax.broadcasted_iota(jnp.int32, (1, cpad), 1) < out_features

    def linear_layernorm(h, w, b, g, be, relu):
        # Padded weight columns / bias lanes are zero, so padded lanes of y are exactly 0
        # and the plain lane-sum equals the sum over the real features.
        y = jnp.dot(h, w, preferred_element_type=jnp.float32) + b
        mu = jnp.sum(y, axis=-1, keepdims=True) * inv_n
        c = y - mu                                   # centered tensor, computed once
        cm = jnp.where(lane_mask, c, 0.0) if lane_mask is not None else c
        var = jnp.sum(cm * cm, axis=-1, keepdims=True) * inv_n
        y = c * jax.lax.rsqrt(var + LN_EPS)
        y = y * g + be                               # padded gamma/beta lanes are 0 -> output 0 there
        if relu:
            y = jnp.maximum(y, 0.0)
        return y

    h = linear_layernorm(x, w1_ref[...], vecs[0:1], vecs[1:2], vecs[2:3], True)
    h = linear_layernorm(h, w2_ref[...], vecs[3:4], vecs[4:5], vecs[5:6], True)
    h = linear_layernorm(h, w3_ref[...], vecs[6:7], vecs[7:8], vecs[8:9], False)
    o_ref[...] = h.astype(o_ref.dtype)


def state_encoder_forward(x, params, *, tm=512):
    """x: (..., in_channel) float32.  params: see init_state_encoder_params.
    Returns (..., out_channel) float32."""
    in_channel, out_channel = params["w1_t"].shape
    assert x.shape[-1] == in_channel
    lead = x.shape[:-1]
    M = int(math.prod(lead)) if lead else 1
    x_flat = x.reshape(M, in_channel).astype(jnp.float32)

    # Lane-dense feature padding and sublane-aligned row tiling.
    cin_p = _round_up(in_channel, _LANE)
    cout_p = _round_up(out_channel, _LANE)
    tm = _round_up(max(tm, _SUBLANE), _SUBLANE)
    tm_eff = min(tm, _round_up(M, _SUBLANE))     # single grid step when M is small
    m_pad = _round_up(M, tm_eff)

    x_p = jnp.zeros((m_pad, cin_p), jnp.float32).at[:M, :in_channel].set(x_flat)

    def pad_w(w_t, rows):
        return jnp.zeros((rows, cout_p), jnp.float32).at[: w_t.shape[0], :out_channel].set(w_t)

    w1 = pad_w(params["w1_t"], cin_p)
    w2 = pad_w(params["w2_t"], cout_p)
    w3 = pad_w(params["w3_t"], cout_p)

    def pad_v(v):
        return jnp.zeros((1, cout_p), jnp.float32).at[:, :out_channel].set(v.reshape(1, -1))

    # Single sublane-aligned constant block for all bias / gamma / beta vectors.
    vec_rows = [pad_v(params[k]) for k in ("b1", "g1", "be1", "b2", "g2", "be2", "b3", "g3", "be3")]
    vecs = jnp.concatenate(vec_rows + [jnp.zeros((16 - len(vec_rows), cout_p), jnp.float32)], axis=0)

    const = lambda shape: pl.BlockSpec(shape, lambda i: (0, 0))
    grid_spec = pltpu.PrefetchScalarGridSpec(
        num_scalar_prefetch=0,
        grid=(m_pad // tm_eff,),
        in_specs=[
            pl.BlockSpec((tm_eff, cin_p), lambda i: (i, 0)),   # activation row tile
            const((cin_p, cout_p)),                            # w1
            const((cout_p, cout_p)),                           # w2
            const((cout_p, cout_p)),                           # w3
            const((16, cout_p)),                               # biases / gammas / betas
        ],
        out_specs=pl.BlockSpec((tm_eff, cout_p), lambda i: (i, 0)),
    )

    # Explicit VMEM budget (double-buffered tiles + weights); raise the scoped limit only
    # when needed, capped at v7x's 64 MiB physical VMEM.
    budget = 2 * 4 * (tm_eff * (cin_p + cout_p) + cin_p * cout_p + 2 * cout_p * cout_p + 16 * cout_p)
    cp_kwargs = dict(dimension_semantics=("parallel",))
    if budget > 12 * 1024 * 1024:
        cp_kwargs["vmem_limit_bytes"] = int(min(budget + (4 << 20), 64 << 20))

    out_p = pl.pallas_call(
        functools.partial(_state_encoder_kernel, out_features=out_channel),
        out_shape=jax.ShapeDtypeStruct((m_pad, cout_p), jnp.float32),
        grid_spec=grid_spec,
        compiler_params=pltpu.CompilerParams(**cp_kwargs),
    )(x_p, w1, w2, w3, vecs)

    return out_p[:M, :out_channel].reshape(*lead, out_channel)


def init_state_encoder_params(key, in_channel, out_channel):
    """Mirrors init_weights: xavier_uniform for Linear weights, zeros for Linear bias,
    ones/zeros for LayerNorm weight/bias.  Linear weights stored pre-transposed (Cin, Cout)."""
    def xavier(key, fan_in, fan_out):
        bound = (6.0 / (fan_in + fan_out)) ** 0.5
        # PyTorch weight is (fan_out, fan_in); generate that then transpose.
        w = jax.random.uniform(key, (fan_out, fan_in), jnp.float32, -bound, bound)
        return jnp.transpose(w)

    k1, k2, k3 = jax.random.split(key, 3)
    z = jnp.zeros((1, out_channel), jnp.float32)
    o = jnp.ones((1, out_channel), jnp.float32)
    return {
        "w1_t": xavier(k1, in_channel, out_channel), "b1": z, "g1": o, "be1": z,
        "w2_t": xavier(k2, out_channel, out_channel), "b2": z, "g2": o, "be2": z,
        "w3_t": xavier(k3, out_channel, out_channel), "b3": z, "g3": o, "be3": z,
    }


def _reference_forward(x_flat, params):
    """Pure-JAX reference (mirrors the PyTorch module) for correctness check."""
    def lin_ln(h, w_t, b, g, be, relu):
        y = h @ w_t + b
        mu = jnp.mean(y, axis=-1, keepdims=True)
        var = jnp.mean((y - mu) ** 2, axis=-1, keepdims=True)
        y = (y - mu) / jnp.sqrt(var + LN_EPS)
        y = y * g + be
        return jnp.maximum(y, 0.0) if relu else y

    h = lin_ln(x_flat, params["w1_t"], params["b1"], params["g1"], params["be1"], True)
    h = lin_ln(h, params["w2_t"], params["b2"], params["g2"], params["be2"], True)
    h = lin_ln(h, params["w3_t"], params["b3"], params["g3"], params["be3"], False)
    return h


if __name__ == "__main__":
    key = jax.random.PRNGKey(0)
    kx, kp = jax.random.split(key)

    batch, seq, in_channel, out_channel = 2, 8, 16, 32
    x = jax.random.normal(kx, (batch, seq, in_channel), jnp.float32)
    params = init_state_encoder_params(kp, in_channel, out_channel)

    # With M = batch*seq = 16 this collapses to a single grid step.
    out = state_encoder_forward(x, params, tm=256)
    out = jax.block_until_ready(out)

    ref = _reference_forward(x.reshape(-1, in_channel), params).reshape(batch, seq, out_channel)
    assert out.shape == (batch, seq, out_channel)
    assert jnp.allclose(out, ref, atol=1e-4, rtol=1e-4), "mismatch vs pure-JAX reference"

    print("KERNEL_OK")
</pallas_src>

<mosaic_0001>
module attributes {stable_mosaic.version = 11 : i64} {
  func.func @_state_encoder_kernel(%arg0: i32, %arg1: memref<16x128xf32, #tpu.memory_space<vmem>>, %arg2: memref<128x128xf32, #tpu.memory_space<vmem>>, %arg3: memref<128x128xf32, #tpu.memory_space<vmem>>, %arg4: memref<128x128xf32, #tpu.memory_space<vmem>>, %arg5: memref<16x128xf32, #tpu.memory_space<vmem>>, %arg6: memref<16x128xf32, #tpu.memory_space<vmem>>) attributes {dimension_semantics = [#tpu.dimension_semantics<parallel>], iteration_bounds = array<i64: 1>, scalar_prefetch = 0 : i64, scratch_operands = 0 : i64, tpu.core_type = #tpu.core_type<tc>, window_params = [{transform_indices = @transform_0, window_bounds = array<i64: 16, 128>}, {pipeline_mode = #tpu.pipeline_mode<synchronous>, transform_indices = @transform_1, window_bounds = array<i64: 128, 128>}, {pipeline_mode = #tpu.pipeline_mode<synchronous>, transform_indices = @transform_2, window_bounds = array<i64: 128, 128>}, {pipeline_mode = #tpu.pipeline_mode<synchronous>, transform_indices = @transform_3, window_bounds = array<i64: 128, 128>}, {pipeline_mode = #tpu.pipeline_mode<synchronous>, transform_indices = @transform_4, window_bounds = array<i64: 16, 128>}, {transform_indices = @transform_5, window_bounds = array<i64: 16, 128>}]} {
    %c0 = arith.constant 0 : index
    %c0_0 = arith.constant 0 : index
    %0 = vector.load %arg1[%c0, %c0_0] : memref<16x128xf32, #tpu.memory_space<vmem>>, vector<16x128xf32>
    %c0_1 = arith.constant 0 : index
    %c0_2 = arith.constant 0 : index
    %1 = vector.load %arg5[%c0_1, %c0_2] : memref<16x128xf32, #tpu.memory_space<vmem>>, vector<16x128xf32>
    %2 = tpu.iota {dimensions = array<i32: 1>} : vector<1x128xi32>
    %c32_i32 = arith.constant 32 : i32
    %3 = vector.broadcast %c32_i32 : i32 to vector<1x128xi32>
    %4 = arith.cmpi slt, %2, %3 : vector<1x128xi32>
    %c0_3 = arith.constant 0 : index
    %c0_4 = arith.constant 0 : index
    %5 = vector.load %arg2[%c0_3, %c0_4] : memref<128x128xf32, #tpu.memory_space<vmem>>, vector<128x128xf32>
    %6 = vector.extract_strided_slice %1 {offsets = [0, 0], sizes = [1, 128], strides = [1, 1]} : vector<16x128xf32> to vector<1x128xf32>
    %7 = vector.extract_strided_slice %1 {offsets = [1, 0], sizes = [1, 128], strides = [1, 1]} : vector<16x128xf32> to vector<1x128xf32>
    %8 = vector.extract_strided_slice %1 {offsets = [2, 0], sizes = [1, 128], strides = [1, 1]} : vector<16x128xf32> to vector<1x128xf32>
    %cst = arith.constant dense<0.000000e+00> : vector<16x128xf32>
    %9 = tpu.matmul %0, %5, %cst {dimension_numbers = #tpu.dot_dimension_numbers<[1], [0], [0], [1], [0, 0, 1, 1], [], []>} : vector<16x128xf32>, vector<128x128xf32>, vector<16x128xf32> -> vector<16x128xf32>
    %10 = vector.broadcast %6 : vector<1x128xf32> to vector<16x128xf32>
    %11 = arith.addf %9, %10 : vector<16x128xf32>
    %cst_5 = arith.constant dense<0.000000e+00> : vector<16xf32>
    %12 = vector.multi_reduction <add>, %11, %cst_5 [1] : vector<16x128xf32> to vector<16xf32>
    %13 = vector.shape_cast %12 : vector<16xf32> to vector<16x1xf32>
    %cst_6 = arith.constant 3.125000e-02 : f32
    %14 = vector.broadcast %cst_6 : f32 to vector<16x1xf32>
    %15 = arith.mulf %13, %14 : vector<16x1xf32>
    %16 = vector.broadcast %15 : vector<16x1xf32> to vector<16x128xf32>
    %17 = arith.subf %11, %16 : vector<16x128xf32>
    %cst_7 = arith.constant 0.000000e+00 : f32
    %18 = vector.shape_cast %4 : vector<1x128xi1> to vector<1x128xi1>
    %19 = vector.broadcast %18 : vector<1x128xi1> to vector<16x128xi1>
    %20 = vector.broadcast %cst_7 : f32 to vector<16x128xf32>
    %21 = arith.select %19, %17, %20 : vector<16x128xi1>, vector<16x128xf32>
    %22 = arith.mulf %21, %21 : vector<16x128xf32>
    %cst_8 = arith.constant dense<0.000000e+00> : vector<16xf32>
    %23 = vector.multi_reduction <add>, %22, %cst_8 [1] : vector<16x128xf32> to vector<16xf32>
    %24 = vector.shape_cast %23 : vector<16xf32> to vector<16x1xf32>
    %cst_9 = arith.constant 3.125000e-02 : f32
    %25 = vector.broadcast %cst_9 : f32 to vector<16x1xf32>
    %26 = arith.mulf %24, %25 : vector<16x1xf32>
    %cst_10 = arith.constant 9.99999974E-6 : f32
    %27 = vector.broadcast %cst_10 : f32 to vector<16x1xf32>
    %28 = arith.addf %26, %27 : vector<16x1xf32>
    %29 = math.rsqrt %28 : vector<16x1xf32>
    %30 = vector.broadcast %29 : vector<16x1xf32> to vector<16x128xf32>
    %31 = arith.mulf %17, %30 : vector<16x128xf32>
    %32 = vector.broadcast %7 : vector<1x128xf32> to vector<16x128xf32>
    %33 = arith.mulf %31, %32 : vector<16x128xf32>
    %34 = vector.broadcast %8 : vector<1x128xf32> to vector<16x128xf32>
    %35 = arith.addf %33, %34 : vector<16x128xf32>
    %cst_11 = arith.constant 0.000000e+00 : f32
    %36 = vector.broadcast %cst_11 : f32 to vector<16x128xf32>
    %37 = arith.maximumf %35, %36 : vector<16x128xf32>
    %c0_12 = arith.constant 0 : index
    %c0_13 = arith.constant 0 : index
    %38 = vector.load %arg3[%c0_12, %c0_13] : memref<128x128xf32, #tpu.memory_space<vmem>>, vector<128x128xf32>
    %39 = vector.extract_strided_slice %1 {offsets = [3, 0], sizes = [1, 128], strides = [1, 1]} : vector<16x128xf32> to vector<1x128xf32>
    %40 = vector.extract_strided_slice %1 {offsets = [4, 0], sizes = [1, 128], strides = [1, 1]} : vector<16x128xf32> to vector<1x128xf32>
    %41 = vector.extract_strided_slice %1 {offsets = [5, 0], sizes = [1, 128], strides = [1, 1]} : vector<16x128xf32> to vector<1x128xf32>
    %cst_14 = arith.constant dense<0.000000e+00> : vector<16x128xf32>
    %42 = tpu.matmul %37, %38, %cst_14 {dimension_numbers = #tpu.dot_dimension_numbers<[1], [0], [0], [1], [0, 0, 1, 1], [], []>} : vector<16x128xf32>, vector<128x128xf32>, vector<16x128xf32> -> vector<16x128xf32>
    %43 = vector.broadcast %39 : vector<1x128xf32> to vector<16x128xf32>
    %44 = arith.addf %42, %43 : vector<16x128xf32>
    %cst_15 = arith.constant dense<0.000000e+00> : vector<16xf32>
    %45 = vector.multi_reduction <add>, %44, %cst_15 [1] : vector<16x128xf32> to vector<16xf32>
    %46 = vector.shape_cast %45 : vector<16xf32> to vector<16x1xf32>
    %cst_16 = arith.constant 3.125000e-02 : f32
    %47 = vector.broadcast %cst_16 : f32 to vector<16x1xf32>
    %48 = arith.mulf %46, %47 : vector<16x1xf32>
    %49 = vector.broadcast %48 : vector<16x1xf32> to vector<16x128xf32>
    %50 = arith.subf %44, %49 : vector<16x128xf32>
    %cst_17 = arith.constant 0.000000e+00 : f32
    %51 = vector.shape_cast %4 : vector<1x128xi1> to vector<1x128xi1>
    %52 = vector.broadcast %51 : vector<1x128xi1> to vector<16x128xi1>
    %53 = vector.broadcast %cst_17 : f32 to vector<16x128xf32>
    %54 = arith.select %52, %50, %53 : vector<16x128xi1>, vector<16x128xf32>
    %55 = arith.mulf %54, %54 : vector<16x128xf32>
    %cst_18 = arith.constant dense<0.000000e+00> : vector<16xf32>
    %56 = vector.multi_reduction <add>, %55, %cst_18 [1] : vector<16x128xf32> to vector<16xf32>
    %57 = vector.shape_cast %56 : vector<16xf32> to vector<16x1xf32>
    %cst_19 = arith.constant 3.125000e-02 : f32
    %58 = vector.broadcast %cst_19 : f32 to vector<16x1xf32>
    %59 = arith.mulf %57, %58 : vector<16x1xf32>
    %cst_20 = arith.constant 9.99999974E-6 : f32
    %60 = vector.broadcast %cst_20 : f32 to vector<16x1xf32>
    %61 = arith.addf %59, %60 : vector<16x1xf32>
    %62 = math.rsqrt %61 : vector<16x1xf32>
    %63 = vector.broadcast %62 : vector<16x1xf32> to vector<16x128xf32>
    %64 = arith.mulf %50, %63 : vector<16x128xf32>
    %65 = vector.broadcast %40 : vector<1x128xf32> to vector<16x128xf32>
    %66 = arith.mulf %64, %65 : vector<16x128xf32>
    %67 = vector.broadcast %41 : vector<1x128xf32> to vector<16x128xf32>
    %68 = arith.addf %66, %67 : vector<16x128xf32>
    %cst_21 = arith.constant 0.000000e+00 : f32
    %69 = vector.broadcast %cst_21 : f32 to vector<16x128xf32>
    %70 = arith.maximumf %68, %69 : vector<16x128xf32>
    %c0_22 = arith.constant 0 : index
    %c0_23 = arith.constant 0 : index
    %71 = vector.load %arg4[%c0_22, %c0_23] : memref<128x128xf32, #tpu.memory_space<vmem>>, vector<128x128xf32>
    %72 = vector.extract_strided_slice %1 {offsets = [6, 0], sizes = [1, 128], strides = [1, 1]} : vector<16x128xf32> to vector<1x128xf32>
    %73 = vector.extract_strided_slice %1 {offsets = [7, 0], sizes = [1, 128], strides = [1, 1]} : vector<16x128xf32> to vector<1x128xf32>
    %74 = vector.extract_strided_slice %1 {offsets = [8, 0], sizes = [1, 128], strides = [1, 1]} : vector<16x128xf32> to vector<1x128xf32>
    %cst_24 = arith.constant dense<0.000000e+00> : vector<16x128xf32>
    %75 = tpu.matmul %70, %71, %cst_24 {dimension_numbers = #tpu.dot_dimension_numbers<[1], [0], [0], [1], [0, 0, 1, 1], [], []>} : vector<16x128xf32>, vector<128x128xf32>, vector<16x128xf32> -> vector<16x128xf32>
    %76 = vector.broadcast %72 : vector<1x128xf32> to vector<16x128xf32>
    %77 = arith.addf %75, %76 : vector<16x128xf32>
    %cst_25 = arith.constant dense<0.000000e+00> : vector<16xf32>
    %78 = vector.multi_reduction <add>, %77, %cst_25 [1] : vector<16x128xf32> to vector<16xf32>
    %79 = vector.shape_cast %78 : vector<16xf32> to vector<16x1xf32>
    %cst_26 = arith.constant 3.125000e-02 : f32
    %80 = vector.broadcast %cst_26 : f32 to vector<16x1xf32>
    %81 = arith.mulf %79, %80 : vector<16x1xf32>
    %82 = vector.broadcast %81 : vector<16x1xf32> to vector<16x128xf32>
    %83 = arith.subf %77, %82 : vector<16x128xf32>
    %cst_27 = arith.constant 0.000000e+00 : f32
    %84 = vector.shape_cast %4 : vector<1x128xi1> to vector<1x128xi1>
    %85 = vector.broadcast %84 : vector<1x128xi1> to vector<16x128xi1>
    %86 = vector.broadcast %cst_27 : f32 to vector<16x128xf32>
    %87 = arith.select %85, %83, %86 : vector<16x128xi1>, vector<16x128xf32>
    %88 = arith.mulf %87, %87 : vector<16x128xf32>
    %cst_28 = arith.constant dense<0.000000e+00> : vector<16xf32>
    %89 = vector.multi_reduction <add>, %88, %cst_28 [1] : vector<16x128xf32> to vector<16xf32>
    %90 = vector.shape_cast %89 : vector<16xf32> to vector<16x1xf32>
    %cst_29 = arith.constant 3.125000e-02 : f32
    %91 = vector.broadcast %cst_29 : f32 to vector<16x1xf32>
    %92 = arith.mulf %90, %91 : vector<16x1xf32>
    %cst_30 = arith.constant 9.99999974E-6 : f32
    %93 = vector.broadcast %cst_30 : f32 to vector<16x1xf32>
    %94 = arith.addf %92, %93 : vector<16x1xf32>
    %95 = math.rsqrt %94 : vector<16x1xf32>
    %96 = vector.broadcast %95 : vector<16x1xf32> to vector<16x128xf32>
    %97 = arith.mulf %83, %96 : vector<16x128xf32>
    %98 = vector.broadcast %73 : vector<1x128xf32> to vector<16x128xf32>
    %99 = arith.mulf %97, %98 : vector<16x128xf32>
    %100 = vector.broadcast %74 : vector<1x128xf32> to vector<16x128xf32>
    %101 = arith.addf %99, %100 : vector<16x128xf32>
    %c0_31 = arith.constant 0 : index
    %c0_32 = arith.constant 0 : index
    %102 = vector.load %arg6[%c0_31, %c0_32] : memref<16x128xf32, #tpu.memory_space<vmem>>, vector<16x128xf32>
    tpu.vector_store %arg6[%c0_31, %c0_32], %101 {strides = array<i32>} : memref<16x128xf32, #tpu.memory_space<vmem>>, vector<16x128xf32>,
    return
  }
  func.func @transform_0(%arg0: i32) -> (i32, i32) {
    %c0_i32 = arith.constant 0 : i32
    %c0_i32_0 = arith.constant 0 : i32
    return %arg0, %c0_i32 : i32, i32
  }
  func.func @transform_1(%arg0: i32) -> (i32, i32) {
    %c0_i32 = arith.constant 0 : i32
    %c0_i32_0 = arith.constant 0 : i32
    %c0_i32_1 = arith.constant 0 : i32
    return %c0_i32, %c0_i32_0 : i32, i32
  }
  func.func @transform_2(%arg0: i32) -> (i32, i32) {
    %c0_i32 = arith.constant 0 : i32
    %c0_i32_0 = arith.constant 0 : i32
    %c0_i32_1 = arith.constant 0 : i32
    return %c0_i32, %c0_i32_0 : i32, i32
  }
  func.func @transform_3(%arg0: i32) -> (i32, i32) {
    %c0_i32 = arith.constant 0 : i32
    %c0_i32_0 = arith.constant 0 : i32
    %c0_i32_1 = arith.constant 0 : i32
    return %c0_i32, %c0_i32_0 : i32, i32
  }
  func.func @transform_4(%arg0: i32) -> (i32, i32) {
    %c0_i32 = arith.constant 0 : i32
    %c0_i32_0 = arith.constant 0 : i32
    %c0_i32_1 = arith.constant 0 : i32
    return %c0_i32, %c0_i32_0 : i32, i32
  }
  func.func @transform_5(%arg0: i32) -> (i32, i32) {
    %c0_i32 = arith.constant 0 : i32
    %c0_i32_0 = arith.constant 0 : i32
    return %arg0, %c0_i32 : i32, i32
  }
}

</mosaic_0001>

<bundles_post_ra>
// kernel: tpu_custom_call.1
= control target key start
LH: loop header
LB: loop body
LE: loop exit
PB: predicated region body
PF: predicated region fallthrough
CT: control target
= control target key end

     0   :  { %10 = vsyncpa [#allocation3], 0  ;;  %s952_s0 = inlined_call_operand.hbm [shape: f32[16,128], index: 0, kind: input, shape index: {}]   ;;  %s953_s1 = inlined_call_operand.hbm [shape: f32[128,128], index: 1, kind: input, shape index: {}]   ;;  %s954_s2 = inlined_call_operand.hbm [shape: f32[128,128], index: 2, kind: input, shape index: {}]   ;;  %s955_s3 = inlined_call_operand.hbm [shape: f32[128,128], index: 3, kind: input, shape index: {}]   ;;  %s956_s4 = inlined_call_operand.hbm [shape: f32[16,128], index: 4, kind: input, shape index: {}]   ;;  %s957_s5 = inlined_call_operand.hbm [shape: f32[16,128], index: 5, kind: output, shape index: {}]  }
   0x1   :  { %11 = vsyncpa [#allocation6], 0 }
   0x2   :  { %12 = vsyncpa [#allocation9], 0 }
   0x3   :  { %13 = vsyncpa [#allocation4], 0  ;;  %s823_s18 = smov [#allocation5]   ;;  %s824_s20 = smov [#allocation8]  }
   0x4   :  { %s31_s19 = sshll.u32 %s823_s18, 4  ;;  %s55_s21 = sshll.u32 %s824_s20, 4  ;;  %s32_s19 = int_to_ptr.vmem [resolvable:$true] %s31_s19  ;;  %s56_s21 = int_to_ptr.vmem [resolvable:$true] %s55_s21 }
   0x5   :  { %s703_s22 = scalar_lea.vmem %s32_s19, 2048  ;;  %p708_p1 = scmp.lt.s32.totalorder %s32_s19, %s32_s19 }
   0x6   :  { %p704_p0 = scmp.ne.s32.totalorder %s32_s19, %s703_s22  ;;  %p709_p2 = scmp.lt.s32.totalorder %s703_s22, %s703_s22 }
   0x8   :  { %p710_p3 = por %p709_p2, %p708_p1 }
   0xa   :  { %p711_p4 = pnand %p710_p3, %p704_p0 }
   0xc   :  { %714 = shalt.err (!%p711_p4)
}
   0xd   :  { %s825_s23 = smov 128   ;;  %s826_s24 = smov 8  }
   0xe   :  { %37 = dma.hbm_to_vmem [thread:$0]  %s953_s1, 2048, %s32_s19, [#allocation6], %s825_s23, %s825_s23, %s826_s24  }
   0xf   :  { %s723_s27 = scalar_lea.vmem %s56_s21, 2048  ;;  %p728_p6 = scmp.lt.s32.totalorder %s56_s21, %s56_s21 }
  0x10   :  { %p724_p5 = scmp.ne.s32.totalorder %s56_s21, %s723_s27  ;;  %p729_p7 = scmp.lt.s32.totalorder %s723_s27, %s723_s27 }
  0x12   :  { %p730_p8 = por %p729_p7, %p728_p6 }
  0x14   :  { %p731_p9 = pnand %p730_p8, %p724_p5 }
  0x16   :  { %734 = shalt.err (!%p731_p9)
}
  0x17   :  { %61 = dma.hbm_to_vmem [thread:$0]  %s955_s3, 2048, %s56_s21, [#allocation9], %s825_s23, %s825_s23, %s826_s24  }
  0x18   :  { %s827_s30 = smov [#allocation2]   ;;  %s828_s7 = smov [#allocation7]  }
  0x19   :  { %s19_s6 = sshll.u32 %s827_s30, 4  ;;  %s43_s8 = sshll.u32 %s828_s7, 4  ;;  %s20_s6 = int_to_ptr.vmem [resolvable:$true] %s19_s6  ;;  %s44_s8 = int_to_ptr.vmem [resolvable:$true] %s43_s8 }
  0x1a   :  { %s743_s1 = scalar_lea.vmem %s20_s6, 256  ;;  %p748_p11 = scmp.lt.s32.totalorder %s20_s6, %s20_s6 }
  0x1b   :  { %p744_p10 = scmp.ne.s32.totalorder %s20_s6, %s743_s1  ;;  %p749_p12 = scmp.lt.s32.totalorder %s743_s1, %s743_s1 }
  0x1d   :  { %p750_p13 = por %p749_p12, %p748_p11 }
  0x1f   :  { %p751_p0 = pnand %p750_p13, %p744_p10 }
  0x21   :  { %754 = shalt.err (!%p751_p0)
}
  0x22   :  { %25 = dma.hbm_to_vmem [thread:$0]  %s952_s0, 256, %s20_s6, [#allocation3], %s825_s23, %s825_s23, %s826_s24  }
  0x23   :  { %s763_s3 = scalar_lea.vmem %s44_s8, 2048  ;;  %p768_p2 = scmp.lt.s32.totalorder %s44_s8, %s44_s8 }
  0x24   :  { %p764_p1 = scmp.ne.s32.totalorder %s44_s8, %s763_s3  ;;  %p769_p3 = scmp.lt.s32.totalorder %s763_s3, %s763_s3 }
  0x26   :  { %p770_p4 = por %p769_p3, %p768_p2 }
  0x28   :  { %p771_p5 = pnand %p770_p4, %p764_p1 }
  0x2a   :  { %774 = shalt.err (!%p771_p5)
}
  0x2b   :  { %49 = dma.hbm_to_vmem [thread:$0]  %s954_s2, 2048, %s44_s8, [#allocation6], %s825_s23, %s825_s23, %s826_s24  }
  0x2c   :  { %s829_s13 = smov [#allocation10]  }
  0x2d   :  { %s67_s14 = sshll.u32 %s829_s13, 4  ;;  %s68_s14 = int_to_ptr.vmem [resolvable:$true] %s67_s14 }
  0x2e   :  { %s783_s15 = scalar_lea.vmem %s68_s14, 256  ;;  %p788_p7 = scmp.lt.s32.totalorder %s68_s14, %s68_s14 }
  0x2f   :  { %p784_p6 = scmp.ne.s32.totalorder %s68_s14, %s783_s15  ;;  %p789_p8 = scmp.lt.s32.totalorder %s783_s15, %s783_s15 }
  0x31   :  { %p790_p9 = por %p789_p8, %p788_p7 }
  0x33   :  { %p791_p10 = pnand %p790_p9, %p784_p6 }
  0x35   :  { %794 = shalt.err (!%p791_p10)
}
  0x36   :  { %73 = dma.hbm_to_vmem [thread:$0]  %s956_s4, 256, %s68_s14, [#allocation9], %s825_s23, %s825_s23, %s826_s24  }
  0x37   :  { %815 = dma.done.wait [#allocation3], 256  }
  0x38   :  { %816 = vsyncadd [#allocation3], 4294967040 }
  0x39   :  { %817 = dma.done.wait [#allocation6], 4096  }
  0x3a   :  { %818 = vsyncadd [#allocation6], 4294963200 }
  0x3b   :  { %819 = dma.done.wait [#allocation9], 2304  }
  0x3c   :  { %820 = vsyncadd [#allocation9], 4294964992  ;;  %v111_v0 = vld [vmem:[#allocation5 + $0x78] sm:$0xff]  ;;  %v110_v1 = vld [vmem:[#allocation5 + $0x70] sm:$0xff]  ;;  %v93_v18 = vlaneseq  ;;  %s830_s2 = smov [#allocation11]  }
  0x3d   :  { %570 = vmatprep.subr.mxu0 %v111_v0  ;;  %v109_v2 = vld [vmem:[#allocation5 + $0x68] sm:$0xff]  ;;  %v108_v3 = vld [vmem:[#allocation5 + $0x60] sm:$0xff]  ;;  %v89_v4 = vld [vmem:[#allocation2] sm:$0xff]  ;;  %s502_s4 = sshll.u32 %s830_s2, 4  ;;  %s503_s4 = int_to_ptr.vmem [resolvable:$true] %s502_s4 }
  0x3e   :  { %571 = vmatpush3.msra.mxu0 %v111_v0  ;;  %v107_v5 = vld [vmem:[#allocation5 + $0x58] sm:$0xff]  ;;  %602 = vmatprep.mubr.f32.mxu0 %v89_v4  ;;  %v106_v6 = vld [vmem:[#allocation5 + $0x50] sm:$0xff]  ;;  %v105_v7 = vld [vmem:[#allocation5 + $0x48] sm:$0xff]  ;;  %v891_v19 = vshrl.u32 %v93_v18, 7  ;;  %v899_v28 = vand.u32 127, %v93_v18  ;;  %s795_s17 = scalar_lea.vmem %s503_s4, 256  ;;  %p800_p12 = scmp.lt.s32.totalorder %s503_s4, %s503_s4 }
  0x3f   :  { %572 = vmatprep.subr.mxu0 %v110_v1  ;;  %v104_v8 = vld [vmem:[#allocation5 + $0x40] sm:$0xff]  ;;  %v103_v9 = vld [vmem:[#allocation5 + $0x38] sm:$0xff]  ;;  %v102_v10 = vld [vmem:[#allocation5 + $0x30] sm:$0xff]  ;;  %p796_p11 = scmp.ne.s32.totalorder %s503_s4, %s795_s17  ;;  %p801_p13 = scmp.lt.s32.totalorder %s795_s17, %s795_s17 }
  0x40   :  { %573 = vmatpush3.msra.mxu0 %v110_v1  ;;  %v101_v11 = vld [vmem:[#allocation5 + $0x28] sm:$0xff]  ;;  %v100_v12 = vld [vmem:[#allocation5 + $0x20] sm:$0xff]  ;;  %v99_v13 = vld [vmem:[#allocation5 + $0x18] sm:$0xff]  ;;  %v114_v20 = vsub.s32 0, %v891_v19  ;;  %vm95_vm0 = vcmp.lt.s32.totalorder %v899_v28, 32  ;;  %v219_v60 = vsub.s32 1, %v891_v19 }
  0x41   :  { %574 = vmatprep.subr.mxu0 %v109_v2  ;;  %v98_v14 = vld [vmem:[#allocation5 + $0x10] sm:$0xff]  ;;  %v97_v15 = vld [vmem:[#allocation5 + $0x8] sm:$0xff]  ;;  %v96_v16 = vld [vmem:[#allocation5] sm:$0xff]  ;;  %v225_v61 = vsub.s32 2, %v891_v19  ;;  %p802_p0 = por %p801_p13, %p800_p12 }
  0x42   :  { %575 = vmatpush3.msra.mxu0 %v109_v2  ;;  %v90_v17 = vld [vmem:[#allocation2 + $0x8] sm:$0xff]  ;;  %v894_v21 = vld [vmem:[#allocation10] sm:$0xff]  ;;  %v245_v39 = vld [vmem:[#allocation7 + $0x70] sm:$0xff] }
  0x43   :  { %576 = vmatprep.subr.mxu0 %v108_v3  ;;  %v115_v23 = vrot.slane %v894_v21, %v114_v20  ;;  %v246_v27 = vld [vmem:[#allocation7 + $0x78] sm:$0xff]  ;;  %v244_v40 = vld [vmem:[#allocation7 + $0x68] sm:$0xff]  ;;  %v243_v41 = vld [vmem:[#allocation7 + $0x60] sm:$0xff]  ;;  %v220_v62 = vrot.slane %v894_v21, %v219_v60  ;;  %v226_v1 = vrot.slane %v894_v21, %v225_v61  ;;  %p803_p1 = pnand %p802_p0, %p796_p11 }
  0x44   :  { %577 = vmatpush3.msra.mxu0 %v108_v3  ;;  %605 = vmatprep.subr.mxu1 %v246_v27  ;;  %v242_v42 = vld [vmem:[#allocation7 + $0x58] sm:$0xff]  ;;  %v241_v43 = vld [vmem:[#allocation7 + $0x50] sm:$0xff]  ;;  %v240_v44 = vld [vmem:[#allocation7 + $0x48] sm:$0xff] }
  0x45   :  { %578 = vmatprep.subr.mxu0 %v107_v5  ;;  %606 = vmatpush3.msra.mxu1 %v246_v27  ;;  %v239_v45 = vld [vmem:[#allocation7 + $0x40] sm:$0xff]  ;;  %v238_v46 = vld [vmem:[#allocation7 + $0x38] sm:$0xff]  ;;  %v237_v47 = vld [vmem:[#allocation7 + $0x30] sm:$0xff] }
  0x46   :  { %579 = vmatpush3.msra.mxu0 %v107_v5  ;;  %607 = vmatprep.subr.mxu1 %v245_v39  ;;  %v236_v48 = vld [vmem:[#allocation7 + $0x28] sm:$0xff]  ;;  %v235_v49 = vld [vmem:[#allocation7 + $0x20] sm:$0xff]  ;;  %v234_v50 = vld [vmem:[#allocation7 + $0x18] sm:$0xff] }
  0x47   :  { %580 = vmatprep.subr.mxu0 %v106_v6  ;;  %608 = vmatpush3.msra.mxu1 %v245_v39  ;;  %v233_v51 = vld [vmem:[#allocation7 + $0x10] sm:$0xff]  ;;  %v232_v52 = vld [vmem:[#allocation7 + $0x8] sm:$0xff]  ;;  %v231_v53 = vld [vmem:[#allocation7] sm:$0xff] }
  0x48   :  { %581 = vmatpush3.msra.mxu0 %v106_v6  ;;  %609 = vmatprep.subr.mxu1 %v244_v40  ;;  %v370_v39 = vld [vmem:[#allocation8 + $0x30] sm:$0xff] }
  0x49   :  { %582 = vmatprep.subr.mxu0 %v105_v7  ;;  %610 = vmatpush3.msra.mxu1 %v244_v40  ;;  %v369_v40 = vld [vmem:[#allocation8 + $0x28] sm:$0xff] }
  0x4a   :  { %583 = vmatpush3.msra.mxu0 %v105_v7  ;;  %611 = vmatprep.subr.mxu1 %v243_v41 }
  0x4b   :  { %584 = vmatprep.subr.mxu0 %v104_v8  ;;  %612 = vmatpush3.msra.mxu1 %v243_v41  ;;  %v368_v41 = vld [vmem:[#allocation8 + $0x20] sm:$0xff] }
  0x4c   :  { %585 = vmatpush3.msra.mxu0 %v104_v8  ;;  %613 = vmatprep.subr.mxu1 %v242_v42 }
  0x4d   :  { %586 = vmatprep.subr.mxu0 %v103_v9  ;;  %614 = vmatpush3.msra.mxu1 %v242_v42  ;;  %v367_v42 = vld [vmem:[#allocation8 + $0x18] sm:$0xff] }
  0x4e   :  { %587 = vmatpush3.msra.mxu0 %v103_v9  ;;  %615 = vmatprep.subr.mxu1 %v241_v43 }
  0x4f   :  { %588 = vmatprep.subr.mxu0 %v102_v10  ;;  %616 = vmatpush3.msra.mxu1 %v241_v43  ;;  %v366_v43 = vld [vmem:[#allocation8 + $0x10] sm:$0xff] }
  0x50   :  { %589 = vmatpush3.msra.mxu0 %v102_v10  ;;  %617 = vmatprep.subr.mxu1 %v240_v44  ;;  %v249_v10 = vsub.s32 3, %v891_v19 }
  0x51   :  { %590 = vmatprep.subr.mxu0 %v101_v11  ;;  %618 = vmatpush3.msra.mxu1 %v240_v44  ;;  %v365_v44 = vld [vmem:[#allocation8 + $0x8] sm:$0xff] }
  0x52   :  { %591 = vmatpush3.msra.mxu0 %v101_v11  ;;  %619 = vmatprep.subr.mxu1 %v239_v45  ;;  %v250_v11 = vrot.slane %v894_v21, %v249_v10 }
  0x53   :  { %592 = vmatprep.subr.mxu0 %v100_v12  ;;  %620 = vmatpush3.msra.mxu1 %v239_v45  ;;  %v364_v45 = vld [vmem:[#allocation8] sm:$0xff] }
  0x54   :  { %593 = vmatpush3.msra.mxu0 %v100_v12  ;;  %621 = vmatprep.subr.mxu1 %v238_v46 }
  0x55   :  { %594 = vmatprep.subr.mxu0 %v99_v13  ;;  %622 = vmatpush3.msra.mxu1 %v238_v46 }
  0x56   :  { %595 = vmatpush3.msra.mxu0 %v99_v13  ;;  %623 = vmatprep.subr.mxu1 %v237_v47 }
  0x57   :  { %596 = vmatprep.subr.mxu0 %v98_v14  ;;  %624 = vmatpush3.msra.mxu1 %v237_v47 }
  0x58   :  { %597 = vmatpush3.msra.mxu0 %v98_v14  ;;  %625 = vmatprep.subr.mxu1 %v236_v48 }
  0x59   :  { %598 = vmatprep.subr.mxu0 %v97_v15  ;;  %626 = vmatpush3.msra.mxu1 %v236_v48 }
  0x5a   :  { %599 = vmatpush3.msra.mxu0 %v97_v15  ;;  %627 = vmatprep.subr.mxu1 %v235_v49 }
  0x5b   :  { %600 = vmatprep.subr.mxu0 %v96_v16  ;;  %628 = vmatpush3.msra.mxu1 %v235_v49 }
  0x5c   :  { %601 = vmatpush3.msra.mxu0 %v96_v16  ;;  %629 = vmatprep.subr.mxu1 %v234_v50  ;;  %v379_v16 = vld [vmem:[#allocation8 + $0x78] sm:$0xff] }
  0x5d   :  { %603 = vmatmul.mubr.f32.vlgmr.msra.gmra.mxu0 %v90_v17  ;;  %630 = vmatpush3.msra.mxu1 %v234_v50  ;;  %v378_v17 = vld [vmem:[#allocation8 + $0x70] sm:$0xff] }
  0x5e   :  { %631 = vmatprep.subr.mxu1 %v233_v51  ;;  %640 = vmatprep.subr.mxu0 %v379_v16 }
  0x5f   :  { %632 = vmatpush3.msra.mxu1 %v233_v51  ;;  %641 = vmatpush3.msra.mxu0 %v379_v16 }
  0x60   :  { %633 = vmatprep.subr.mxu1 %v232_v52  ;;  %642 = vmatprep.subr.mxu0 %v378_v17 }
  0x61   :  { %634 = vmatpush3.msra.mxu1 %v232_v52  ;;  %643 = vmatpush3.msra.mxu0 %v378_v17  ;;  %v352_v52 = vsub.s32 4, %v891_v19 }
  0x62   :  { %635 = vmatprep.subr.mxu1 %v231_v53 }
  0x63   :  { %636 = vmatpush3.msra.mxu1 %v231_v53  ;;  %v358_v53 = vsub.s32 5, %v891_v19 }
 0x11d   :  { %v604_v22 = vpop.f32.mrf.mxu0 }
 0x11e   :  { %v188_v26 = vadd.f32 %v604_v22, %v115_v23 }
 0x11f   :  { %v182_v24 = vpop.f32.mrf.mxu0 }
 0x120   :  { %v183_v25 = vadd.f32 %v182_v24, %v115_v23 }
 0x122   :  { %191 = vadd.xlane.f32.xlu0 %v183_v25 }
 0x126   :  { %193 = vadd.xlane.f32.xlu0 %v188_v26 }
 0x1ab   :  { %v192_v29 = vpop.xlane.xlu0 %191 }
 0x1ac   :  { %v195_v30 = vmul.f32 0.03125, %v192_v29 }
 0x1ae   :  { %v902_v31 = vsub.f32 %v183_v25, %v195_v30 }
 0x1af   :  { %v194_v32 = vpop.xlane.xlu0 %193 }
 0x1b0   :  { %v196_v33 = vmul.f32 0.03125, %v194_v32  ;;  %v201_v34 = vsel %vm95_vm0, %v902_v31, 0.0  ;;  %v377_v32 = vld [vmem:[#allocation8 + $0x68] sm:$0xff] }
 0x1b1   :  { %v203_v35 = vmul.f32 %v201_v34, %v201_v34  ;;  %644 = vmatprep.subr.mxu0 %v377_v32  ;;  %v375_v34 = vld [vmem:[#allocation8 + $0x58] sm:$0xff] }
 0x1b2   :  { %v907_v36 = vsub.f32 %v188_v26, %v196_v33  ;;  %645 = vmatpush3.msra.mxu0 %v377_v32  ;;  %v376_v33 = vld [vmem:[#allocation8 + $0x60] sm:$0xff] }
 0x1b3   :  { %205 = vadd.xlane.f32.xlu1 %v203_v35  ;;  %646 = vmatprep.subr.mxu0 %v376_v33  ;;  %v374_v35 = vld [vmem:[#allocation8 + $0x50] sm:$0xff] }
 0x1b4   :  { %v202_v37 = vsel %vm95_vm0, %v907_v36, 0.0  ;;  %647 = vmatpush3.msra.mxu0 %v376_v33 }
 0x1b5   :  { %v204_v38 = vmul.f32 %v202_v37, %v202_v37  ;;  %648 = vmatprep.subr.mxu0 %v375_v34  ;;  %v372_v37 = vld [vmem:[#allocation8 + $0x40] sm:$0xff] }
 0x1b6   :  { %649 = vmatpush3.msra.mxu0 %v375_v34 }
 0x1b7   :  { %207 = vadd.xlane.f32.xlu1 %v204_v38  ;;  %650 = vmatprep.subr.mxu0 %v374_v35  ;;  %v371_v38 = vld [vmem:[#allocation8 + $0x38] sm:$0xff] }
 0x1b8   :  { %651 = vmatpush3.msra.mxu0 %v374_v35 }
 0x23c   :  { %v206_v54 = vpop.xlane.xlu1 %205 }
 0x23d   :  { %v209_v55 = vmul.f32 0.03125, %v206_v54  ;;  %v353_v54 = vrot.slane %v894_v21, %v352_v52 }
 0x23f   :  { %v211_v56 = vadd.f32 1e-05, %v209_v55 }
 0x240   :  { %v208_v57 = vpop.xlane.xlu1 %207 }
 0x241   :  { %683 = vrsqrt.f32 %v211_v56  ;;  %v210_v58 = vmul.f32 0.03125, %v208_v57 }
 0x243   :  { %v212_v59 = vadd.f32 1e-05, %v210_v58  ;;  %v359_v58 = vrot.slane %v894_v21, %v358_v53 }
 0x245   :  { %685 = vrsqrt.f32 %v212_v59 }
 0x24e   :  { %v684_v63 = vpop.eup %683 }
 0x24f   :  { %v215_v0 = vmul.f32 %v684_v63, %v902_v31 }
 0x251   :  { %v221_v2 = vmul.f32 %v220_v62, %v215_v0 }
 0x252   :  { %v686_v3 = vpop.eup %685 }
 0x253   :  { %v227_v4 = vadd.f32 %v226_v1, %v221_v2  ;;  %v216_v5 = vmul.f32 %v686_v3, %v907_v36  ;;  %v373_v36 = vld [vmem:[#allocation8 + $0x48] sm:$0xff]  ;;  %v382_v2 = vsub.s32 6, %v891_v19 }
 0x254   :  { %652 = vmatprep.subr.mxu0 %v373_v36 }
 0x255   :  { %v229_v6 = vmax.f32 %v227_v4, 0.0  ;;  %v222_v7 = vmul.f32 %v220_v62, %v216_v5  ;;  %653 = vmatpush3.msra.mxu0 %v373_v36  ;;  %v383_v3 = vrot.slane %v894_v21, %v382_v2 }
 0x256   :  { %654 = vmatprep.subr.mxu0 %v372_v37 }
 0x257   :  { %637 = vmatprep.mubr.f32.mxu1 %v229_v6  ;;  %v228_v8 = vadd.f32 %v226_v1, %v222_v7  ;;  %655 = vmatpush3.msra.mxu0 %v372_v37 }
 0x258   :  { %656 = vmatprep.subr.mxu0 %v371_v38 }
 0x259   :  { %v230_v9 = vmax.f32 %v228_v8, 0.0  ;;  %657 = vmatpush3.msra.mxu0 %v371_v38 }
 0x25a   :  { %658 = vmatprep.subr.mxu0 %v370_v39 }
 0x25b   :  { %638 = vmatmul.mubr.f32.vlgmr.msra.gmra.mxu1 %v230_v9  ;;  %659 = vmatpush3.msra.mxu0 %v370_v39 }
 0x25c   :  { %660 = vmatprep.subr.mxu0 %v369_v40 }
 0x25d   :  { %661 = vmatpush3.msra.mxu0 %v369_v40 }
 0x25e   :  { %662 = vmatprep.subr.mxu0 %v368_v41 }
 0x25f   :  { %663 = vmatpush3.msra.mxu0 %v368_v41 }
 0x260   :  { %664 = vmatprep.subr.mxu0 %v367_v42 }
 0x261   :  { %665 = vmatpush3.msra.mxu0 %v367_v42 }
 0x262   :  { %666 = vmatprep.subr.mxu0 %v366_v43 }
 0x263   :  { %667 = vmatpush3.msra.mxu0 %v366_v43 }
 0x264   :  { %668 = vmatprep.subr.mxu0 %v365_v44 }
 0x265   :  { %669 = vmatpush3.msra.mxu0 %v365_v44 }
 0x266   :  { %670 = vmatprep.subr.mxu0 %v364_v45 }
 0x267   :  { %671 = vmatpush3.msra.mxu0 %v364_v45 }
 0x31b   :  { %v639_v12 = vpop.f32.mrf.mxu1 }
 0x31c   :  { %v323_v13 = vadd.f32 %v639_v12, %v250_v11 }
 0x31d   :  { %v317_v14 = vpop.f32.mrf.mxu1 }
 0x31e   :  { %v318_v15 = vadd.f32 %v317_v14, %v250_v11  ;;  %328 = vadd.xlane.f32.xlu1 %v323_v13 }
 0x320   :  { %326 = vadd.xlane.f32.xlu0 %v318_v15 }
 0x3a7   :  { %v329_v18 = vpop.xlane.xlu1 %328 }
 0x3a8   :  { %v331_v22 = vmul.f32 0.03125, %v329_v18 }
 0x3a9   :  { %v327_v23 = vpop.xlane.xlu0 %326 }
 0x3aa   :  { %v920_v24 = vsub.f32 %v323_v13, %v331_v22  ;;  %v330_v25 = vmul.f32 0.03125, %v327_v23 }
 0x3ac   :  { %v922_v26 = vsub.f32 %v318_v15, %v330_v25  ;;  %v335_v27 = vsel %vm95_vm0, %v920_v24, 0.0 }
 0x3ad   :  { %v337_v29 = vmul.f32 %v335_v27, %v335_v27  ;;  %v485_v27 = vsub.s32 7, %v891_v19 }
 0x3ae   :  { %v334_v30 = vsel %vm95_vm0, %v922_v26, 0.0 }
 0x3af   :  { %340 = vadd.xlane.f32.xlu1 %v337_v29  ;;  %v336_v31 = vmul.f32 %v334_v30, %v334_v30  ;;  %v92_v29 = vld [vmem:[#allocation10 + $0x8] sm:$0xff]  ;;  %v486_v30 = vrot.slane %v894_v21, %v485_v27 }
 0x3b0   :  { %v492_v28 = vrot.slane %v92_v29, %v114_v20 }
 0x3b1   :  { %338 = vadd.xlane.f32.xlu0 %v336_v31 }
 0x438   :  { %v341_v46 = vpop.xlane.xlu1 %340 }
 0x439   :  { %v343_v47 = vmul.f32 0.03125, %v341_v46 }
 0x43a   :  { %v339_v48 = vpop.xlane.xlu0 %338 }
 0x43b   :  { %v345_v49 = vadd.f32 1e-05, %v343_v47  ;;  %v342_v50 = vmul.f32 0.03125, %v339_v48 }
 0x43d   :  { %687 = vrsqrt.f32 %v345_v49  ;;  %v344_v51 = vadd.f32 1e-05, %v342_v50 }
 0x43f   :  { %689 = vrsqrt.f32 %v344_v51 }
 0x44a   :  { %v688_v55 = vpop.eup %687 }
 0x44b   :  { %v349_v56 = vmul.f32 %v688_v55, %v920_v24 }
 0x44c   :  { %v690_v57 = vpop.eup %689 }
 0x44d   :  { %v348_v59 = vmul.f32 %v690_v57, %v922_v26  ;;  %v355_v60 = vmul.f32 %v353_v54, %v349_v56 }
 0x44f   :  { %v354_v61 = vmul.f32 %v353_v54, %v348_v59  ;;  %v361_v62 = vadd.f32 %v359_v58, %v355_v60 }
 0x451   :  { %v360_v63 = vadd.f32 %v359_v58, %v354_v61  ;;  %v363_v1 = vmax.f32 %v361_v62, 0.0 }
 0x453   :  { %v362_v0 = vmax.f32 %v360_v63, 0.0 }
 0x455   :  { %672 = vmatprep.mubr.f32.mxu0 %v362_v0 }
 0x456   :  { %673 = vmatmul.mubr.f32.vlgmr.msra.gmra.mxu0 %v363_v1 }
 0x516   :  { %v674_v4 = vpop.f32.mrf.mxu0 }
 0x517   :  { %v456_v5 = vadd.f32 %v674_v4, %v383_v3 }
 0x518   :  { %v450_v6 = vpop.f32.mrf.mxu0 }
 0x519   :  { %v451_v7 = vadd.f32 %v450_v6, %v383_v3  ;;  %461 = vadd.xlane.f32.xlu1 %v456_v5 }
 0x51b   :  { %459 = vadd.xlane.f32.xlu0 %v451_v7 }
 0x5a2   :  { %v462_v8 = vpop.xlane.xlu1 %461 }
 0x5a3   :  { %v464_v9 = vmul.f32 0.03125, %v462_v8 }
 0x5a4   :  { %v460_v10 = vpop.xlane.xlu0 %459 }
 0x5a5   :  { %v466_v11 = vsub.f32 %v456_v5, %v464_v9  ;;  %v463_v12 = vmul.f32 0.03125, %v460_v10 }
 0x5a7   :  { %v465_v13 = vsub.f32 %v451_v7, %v463_v12  ;;  %v468_v14 = vsel %vm95_vm0, %v466_v11, 0.0 }
 0x5a8   :  { %v470_v15 = vmul.f32 %v468_v14, %v468_v14 }
 0x5a9   :  { %v467_v16 = vsel %vm95_vm0, %v465_v13, 0.0 }
 0x5aa   :  { %473 = vadd.xlane.f32.xlu1 %v470_v15  ;;  %v469_v17 = vmul.f32 %v467_v16, %v467_v16 }
 0x5ac   :  { %471 = vadd.xlane.f32.xlu0 %v469_v17 }
 0x633   :  { %v474_v18 = vpop.xlane.xlu1 %473 }
 0x634   :  { %v476_v22 = vmul.f32 0.03125, %v474_v18 }
 0x635   :  { %v472_v23 = vpop.xlane.xlu0 %471 }
 0x636   :  { %v478_v24 = vadd.f32 1e-05, %v476_v22  ;;  %v475_v25 = vmul.f32 0.03125, %v472_v23 }
 0x638   :  { %691 = vrsqrt.f32 %v478_v24  ;;  %v477_v26 = vadd.f32 1e-05, %v475_v25 }
 0x63a   :  { %693 = vrsqrt.f32 %v477_v26 }
 0x645   :  { %v692_v31 = vpop.eup %691 }
 0x646   :  { %v482_v32 = vmul.f32 %v692_v31, %v466_v11 }
 0x647   :  { %v694_v33 = vpop.eup %693 }
 0x648   :  { %v481_v34 = vmul.f32 %v694_v33, %v465_v13  ;;  %v488_v35 = vmul.f32 %v486_v30, %v482_v32 }
 0x64a   :  { %v487_v36 = vmul.f32 %v486_v30, %v481_v34  ;;  %v494_v37 = vadd.f32 %v492_v28, %v488_v35 }
 0x64c   :  { %v493_v38 = vadd.f32 %v492_v28, %v487_v36  ;;  %496 = vst [vmem:[#allocation11 + $0x8] sm:$0xff] %v494_v37 }
 0x64e   :  { %495 = vst [vmem:[#allocation11] sm:$0xff] %v493_v38 }
 0x64f   :  { %806 = shalt.err (!%p803_p1)
}
 0x650   :  { %508 = dma.vmem_to_hbm [thread:$0]  %s503_s4, 256, %s957_s5, [#allocation4], %s825_s23, %s825_s23, %s826_s24  }
 0x651   :  { %821 = dma.done.wait [#allocation4], 256  }
 0x652   :  { %822 = vsyncadd [#allocation4], 4294967040 }
 0x653   :  { %512 = vsyncpa [#allocation3], 1 }
 0x654   :  { %513 = vsyncpa [#allocation6], 1 }
 0x655   :  { %514 = vsyncpa [#allocation9], 1 }
 0x656   :  { %515 = vsyncpa [#allocation4], 1 }

</bundles_post_ra>
